<compile_context>
chip_gen: v5e
topology: v5e:2x2
jax: 0.10.0
libtpu: 0.0.40
codegen_flags: <defaults>
</compile_context>

<pallas_src>
import jax
import jax.numpy as jnp
from jax.experimental import pallas as pl
from jax.experimental.pallas import tpu as pltpu


def _chip_defaults():
    """(block_budget_bytes, min_parallel_grid, vmem_soft_cap_bytes) per chip."""
    try:
        kind = jax.devices()[0].device_kind.lower()
    except Exception:
        kind = ""
    if "v7" in kind:
        # 2 TCs/chip, 64 MiB VMEM/TC, ~3.2 TB/s HBM: bigger blocks, keep the
        # parallel axis >= 2 so both TensorCores get work.
        return 14 * 1024 * 1024, 2, 56 * 1024 * 1024
    if "v6" in kind:
        # 128 MiB VMEM, ~1.4 TB/s HBM: generous blocks are free.
        return 20 * 1024 * 1024, 1, 100 * 1024 * 1024
    if "v5" in kind:
        # ~820 GB/s HBM: 6-8 MiB blocks already hide the per-step overhead.
        return 7 * 1024 * 1024, 1, 100 * 1024 * 1024
    # Unknown device (incl. CPU interpret): conservative defaults.
    return 8 * 1024 * 1024, 1, 64 * 1024 * 1024


def _choose_tiles(B, C, HW, itemsize, block_budget_bytes, min_parallel):
    """Pick (BT, THW) so one x block is <= block_budget_bytes."""
    per_col = max(1, C * itemsize)          # bytes of one (1, C, 1) column
    full_tile = per_col * HW                # one batch element, full spatial
    if full_tile <= block_budget_bytes:
        # Whole spatial extent fits in one block: pack as many batch elements
        # as the budget allows (largest divisor of B), keeping the parallel
        # grid axis at least `min_parallel` long when possible.
        thw = HW
        max_bt = max(1, block_budget_bytes // full_tile)
        bt = 1
        for cand in range(min(max_bt, B), 0, -1):
            if B % cand == 0 and (B // cand) >= min_parallel:
                bt = cand
                break
        return bt, thw
    # Spatial axis must be tiled: BT=1 and a 128-aligned lane-dense tile.
    max_thw = max(128, block_budget_bytes // per_col)
    thw = max(128, (min(max_thw, HW) // 128) * 128)
    return 1, thw


def _make_kernel(HW, THW, BT, C, needs_mask):
    inv_hw = 1.0 / float(HW)

    def kernel(x_ref, w1t_ref, w2t_ref, o_ref, acc_ref):
        # x_ref  : (BT, C, THW) one spatial tile of BT batch elements
        # w1t_ref: (C, Cr)   conv1 weight, pre-transposed
        # w2t_ref: (Cr, C)   conv2 weight, pre-transposed
        # o_ref  : (BT, 1, C) sigmoid(channel attention logits), lane-dense
        # acc_ref: (2*BT, C) f32 accumulator: rows [0:BT] max, [BT:2BT] sum
        k = pl.program_id(1)
        nk = pl.num_programs(1)

        @pl.when(k == 0)
        def _init():
            row = jax.lax.broadcasted_iota(jnp.int32, acc_ref.shape, 0)
            acc_ref[...] = jnp.where(row < BT, -jnp.inf, 0.0).astype(jnp.float32)

        def _accumulate(x_for_max, x_for_sum):
            acc_ref[0:BT, :] = jnp.maximum(
                acc_ref[0:BT, :],
                jnp.max(x_for_max, axis=-1).astype(jnp.float32),
            )
            acc_ref[BT:2 * BT, :] = acc_ref[BT:2 * BT, :] + jnp.sum(
                x_for_sum, axis=-1, dtype=jnp.float32
            )

        if needs_mask:
            # Fast (unmasked) path for every full tile; the iota/where mask is
            # only paid on the single ragged last tile.
            @pl.when(k < nk - 1)
            def _full_tile():
                xb = x_ref[...]
                _accumulate(xb, xb)

            @pl.when(k == nk - 1)
            def _ragged_tile():
                xb = x_ref[...]
                lane = jax.lax.broadcasted_iota(jnp.int32, xb.shape, 2)
                valid = (lane + k * THW) < HW
                neg = jnp.array(-jnp.inf, dtype=xb.dtype)
                _accumulate(
                    jnp.where(valid, xb, neg),
                    jnp.where(valid, xb, jnp.zeros_like(xb)),
                )
        else:
            xb = x_ref[...]
            _accumulate(xb, xb)

        @pl.when(k == nk - 1)
        def _finalize():
            pooled = acc_ref[...]                                  # (2*BT, C)
            # Rows [BT:2BT] hold the running sum -> scale to the mean.
            row = jax.lax.broadcasted_iota(jnp.int32, pooled.shape, 0)
            pooled = jnp.where(row < BT, pooled, pooled * jnp.float32(inv_hw))

            # Shared MLP on both pooled branches in a single matmul pair;
            # weights stay in their native dtype (f32 accumulate on the MXU).
            h = jnp.maximum(
                jnp.dot(pooled, w1t_ref[...], preferred_element_type=jnp.float32),
                0.0,
            )                                                      # (2*BT, Cr)
            y = jnp.dot(h, w2t_ref[...], preferred_element_type=jnp.float32)
            logits = y[0:BT, :] + y[BT:2 * BT, :]                  # (BT, C)
            o_ref[:, 0, :] = jax.nn.sigmoid(logits).astype(o_ref.dtype)

    return kernel


def channel_attention(x_nchw, w1, w2, *, thw=None, bt=None,
                      block_budget_bytes=None):
    """x_nchw: (B, C, H, W); w1: (C//r, C); w2: (C, C//r). Returns (B, C, 1, 1)."""
    B, C, H, W = x_nchw.shape
    Cr = w1.shape[0]
    HW = H * W
    itemsize = jnp.dtype(x_nchw.dtype).itemsize
    assert jnp.issubdtype(x_nchw.dtype, jnp.floating), (
        "channel_attention kernel requires a floating dtype (uses -inf sentinel)"
    )

    budget, min_parallel, vmem_soft_cap = _chip_defaults()
    if block_budget_bytes is not None:
        budget = block_budget_bytes

    auto_bt, auto_thw = _choose_tiles(B, C, HW, itemsize, budget, min_parallel)
    BT = bt if bt is not None else auto_bt
    THW = thw if thw is not None else auto_thw
    assert B % BT == 0, "batch tile must divide B"
    assert THW == HW or THW % 128 == 0, "spatial tile must be 128-aligned or full"

    nk = pl.cdiv(HW, THW)
    needs_mask = (HW % THW) != 0

    x_flat = x_nchw.reshape(B, C, HW)
    w1t = jnp.transpose(w1)      # (C, Cr)
    w2t = jnp.transpose(w2)      # (Cr, C)

    # Right-size the VMEM limit: double-buffered x block + weights + out +
    # accumulator + margin, clamped to a per-chip soft cap.
    block_bytes = BT * C * THW * itemsize
    w_bytes = (w1t.size * jnp.dtype(w1t.dtype).itemsize
               + w2t.size * jnp.dtype(w2t.dtype).itemsize)
    out_bytes = BT * C * itemsize
    scratch_bytes = 2 * BT * C * 4
    need = 2 * block_bytes + 2 * w_bytes + 2 * out_bytes + scratch_bytes
    vmem_limit = int(min(max(need + (4 << 20), 16 << 20), vmem_soft_cap))

    kernel = _make_kernel(HW, THW, BT, C, needs_mask)

    out = pl.pallas_call(
        kernel,
        out_shape=jax.ShapeDtypeStruct((B, 1, C), x_nchw.dtype),
        grid_spec=pltpu.PrefetchScalarGridSpec(
            num_scalar_prefetch=0,
            grid=(B // BT, nk),
            in_specs=[
                pl.BlockSpec((BT, C, THW), lambda b, k: (b, 0, k)),
                pl.BlockSpec((C, Cr), lambda b, k: (0, 0)),
                pl.BlockSpec((Cr, C), lambda b, k: (0, 0)),
            ],
            out_specs=pl.BlockSpec((BT, 1, C), lambda b, k: (b, 0, 0)),
            scratch_shapes=[
                pltpu.VMEM((2 * BT, C), jnp.float32),   # [0:BT]=max, [BT:]=sum
            ],
        ),
        compiler_params=pltpu.CompilerParams(
            dimension_semantics=("parallel", "arbitrary"),
            vmem_limit_bytes=vmem_limit,
        ),
    )(x_flat, w1t, w2t)

    return out.reshape(B, C, 1, 1)


def _reference(x_nchw, w1, w2):
    # Pure-JAX reference for correctness checking.
    xf = x_nchw.astype(jnp.float32)
    mx = jnp.max(xf, axis=(2, 3))                        # (B, C)
    av = jnp.mean(xf, axis=(2, 3))                       # (B, C)

    def mlp(p):
        h = jnp.maximum(p @ w1.astype(jnp.float32).T, 0.0)
        return h @ w2.astype(jnp.float32).T

    y = jax.nn.sigmoid(mlp(av) + mlp(mx))                # (B, C)
    return y[:, :, None, None].astype(x_nchw.dtype)


if __name__ == "__main__":
    B, C, H, W = 2, 16, 16, 16
    ratio = 4
    Cr = C // ratio

    key = jax.random.PRNGKey(0)
    kx, k1, k2 = jax.random.split(key, 3)

    x = jax.random.normal(kx, (B, C, H, W), dtype=jnp.float32)
    # Deterministic synthetic weights (conv weights squeezed from (O,I,1,1) -> (O,I)).
    w1 = jax.random.normal(k1, (Cr, C), dtype=jnp.float32) * 0.2
    w2 = jax.random.normal(k2, (C, Cr), dtype=jnp.float32) * 0.2

    out = jax.block_until_ready(channel_attention(x, w1, w2))
    ref = _reference(x, w1, w2)
    assert out.shape == (B, C, 1, 1)
    assert jnp.allclose(out, ref, atol=1e-5, rtol=1e-5)

    # Also exercise the tiled + masked spatial-reduction path
    # (non-128-multiple spatial extent, multi-step reduction grid with the
    # mask gated onto the last tile only).
    x2 = jax.random.normal(kx, (B, C, 20, 23), dtype=jnp.float32)
    out2 = jax.block_until_ready(channel_attention(x2, w1, w2, thw=128))
    ref2 = _reference(x2, w1, w2)
    assert jnp.allclose(out2, ref2, atol=1e-5, rtol=1e-5)

    print("KERNEL_OK")
</pallas_src>

<mosaic_0001>
module attributes {stable_mosaic.version = 11 : i64} {
  func.func @kernel(%arg0: i32, %arg1: i32, %arg2: memref<2x16x256xf32, #tpu.memory_space<vmem>>, %arg3: memref<16x4xf32, #tpu.memory_space<vmem>>, %arg4: memref<4x16xf32, #tpu.memory_space<vmem>>, %arg5: memref<2x1x16xf32, #tpu.memory_space<vmem>>, %arg6: memref<4x16xf32, #tpu.memory_space<vmem>>) attributes {dimension_semantics = [#tpu.dimension_semantics<parallel>, #tpu.dimension_semantics<arbitrary>], iteration_bounds = array<i64: 1, 1>, scalar_prefetch = 0 : i64, scratch_operands = 1 : i64, tpu.core_type = #tpu.core_type<tc>, window_params = [{transform_indices = @transform_0, window_bounds = array<i64: 2, 16, 256>}, {pipeline_mode = #tpu.pipeline_mode<synchronous>, transform_indices = @transform_1, window_bounds = array<i64: 16, 4>}, {pipeline_mode = #tpu.pipeline_mode<synchronous>, transform_indices = @transform_2, window_bounds = array<i64: 4, 16>}, {transform_indices = @transform_3, window_bounds = array<i64: 2, 1, 16>}]} {
    %c0_i32 = arith.constant 0 : i32
    %0 = arith.cmpi eq, %arg1, %c0_i32 : i32
    %1 = arith.extui %0 : i1 to i32
    %c0_i32_0 = arith.constant 0 : i32
    %2 = arith.cmpi ne, %1, %c0_i32_0 : i32
    scf.if %2 {
      %15 = tpu.iota {dimensions = array<i32: 0>} : vector<4x16xi32>
      %c2_i32 = arith.constant 2 : i32
      %16 = vector.broadcast %c2_i32 : i32 to vector<4x16xi32>
      %17 = arith.cmpi slt, %15, %16 : vector<4x16xi32>
      %cst_13 = arith.constant 0xFF800000 : f32
      %cst_14 = arith.constant 0.000000e+00 : f32
      %18 = vector.broadcast %cst_13 : f32 to vector<4x16xf32>
      %19 = vector.broadcast %cst_14 : f32 to vector<4x16xf32>
      %20 = arith.select %17, %18, %19 : vector<4x16xi1>, vector<4x16xf32>
      %c0_15 = arith.constant 0 : index
      %c0_16 = arith.constant 0 : index
      %21 = vector.load %arg6[%c0_15, %c0_16] : memref<4x16xf32, #tpu.memory_space<vmem>>, vector<4x16xf32>
      tpu.vector_store %arg6[%c0_15, %c0_16], %20 {strides = array<i32>} : memref<4x16xf32, #tpu.memory_space<vmem>>, vector<4x16xf32>,
    } else {
    }
    %c0 = arith.constant 0 : index
    %c0_1 = arith.constant 0 : index
    %c0_2 = arith.constant 0 : index
    %3 = vector.load %arg2[%c0, %c0_1, %c0_2] : memref<2x16x256xf32, #tpu.memory_space<vmem>>, vector<2x16x256xf32>
    %c0_3 = arith.constant 0 : index
    %c0_4 = arith.constant 0 : index
    %4 = vector.load %arg6[%c0_3, %c0_4] : memref<4x16xf32, #tpu.memory_space<vmem>>, vector<2x16xf32>
    %cst = arith.constant dense<0xFF800000> : vector<2x16xf32>
    %5 = vector.multi_reduction <maximumf>, %3, %cst [2] : vector<2x16x256xf32> to vector<2x16xf32>
    %6 = arith.maximumf %4, %5 : vector<2x16xf32>
    %c0_5 = arith.constant 0 : index
    %c0_6 = arith.constant 0 : index
    %7 = vector.load %arg6[%c0_5, %c0_6] : memref<4x16xf32, #tpu.memory_space<vmem>>, vector<2x16xf32>
    tpu.vector_store %arg6[%c0_5, %c0_6], %6 {strides = array<i32>} : memref<4x16xf32, #tpu.memory_space<vmem>>, vector<2x16xf32>,
    %c2 = arith.constant 2 : index
    %c0_7 = arith.constant 0 : index
    %8 = vector.load %arg6[%c2, %c0_7] : memref<4x16xf32, #tpu.memory_space<vmem>>, vector<2x16xf32>
    %cst_8 = arith.constant dense<0.000000e+00> : vector<2x16xf32>
    %9 = vector.multi_reduction <add>, %3, %cst_8 [2] : vector<2x16x256xf32> to vector<2x16xf32>
    %10 = arith.addf %8, %9 : vector<2x16xf32>
    %c2_9 = arith.constant 2 : index
    %c0_10 = arith.constant 0 : index
    %11 = vector.load %arg6[%c2_9, %c0_10] : memref<4x16xf32, #tpu.memory_space<vmem>>, vector<2x16xf32>
    tpu.vector_store %arg6[%c2_9, %c0_10], %10 {strides = array<i32>} : memref<4x16xf32, #tpu.memory_space<vmem>>, vector<2x16xf32>,
    %c0_i32_11 = arith.constant 0 : i32
    %12 = arith.cmpi eq, %arg1, %c0_i32_11 : i32
    %13 = arith.extui %12 : i1 to i32
    %c0_i32_12 = arith.constant 0 : i32
    %14 = arith.cmpi ne, %13, %c0_i32_12 : i32
    scf.if %14 {
      %c0_13 = arith.constant 0 : index
      %c0_14 = arith.constant 0 : index
      %15 = vector.load %arg6[%c0_13, %c0_14] : memref<4x16xf32, #tpu.memory_space<vmem>>, vector<4x16xf32>
      %16 = tpu.iota {dimensions = array<i32: 0>} : vector<4x16xi32>
      %c2_i32 = arith.constant 2 : i32
      %17 = vector.broadcast %c2_i32 : i32 to vector<4x16xi32>
      %18 = arith.cmpi slt, %16, %17 : vector<4x16xi32>
      %cst_15 = arith.constant 3.906250e-03 : f32
      %19 = vector.broadcast %cst_15 : f32 to vector<4x16xf32>
      %20 = arith.mulf %15, %19 : vector<4x16xf32>
      %21 = arith.select %18, %15, %20 : vector<4x16xi1>, vector<4x16xf32>
      %c0_16 = arith.constant 0 : index
      %c0_17 = arith.constant 0 : index
      %22 = vector.load %arg3[%c0_16, %c0_17] : memref<16x4xf32, #tpu.memory_space<vmem>>, vector<16x4xf32>
      %cst_18 = arith.constant dense<0.000000e+00> : vector<4x4xf32>
      %23 = tpu.matmul %21, %22, %cst_18 {dimension_numbers = #tpu.dot_dimension_numbers<[1], [0], [0], [1], [0, 0, 1, 1], [], []>} : vector<4x16xf32>, vector<16x4xf32>, vector<4x4xf32> -> vector<4x4xf32>
      %cst_19 = arith.constant 0.000000e+00 : f32
      %24 = vector.broadcast %cst_19 : f32 to vector<4x4xf32>
      %25 = arith.maximumf %23, %24 : vector<4x4xf32>
      %c0_20 = arith.constant 0 : index
      %c0_21 = arith.constant 0 : index
      %26 = vector.load %arg4[%c0_20, %c0_21] : memref<4x16xf32, #tpu.memory_space<vmem>>, vector<4x16xf32>
      %cst_22 = arith.constant dense<0.000000e+00> : vector<4x16xf32>
      %27 = tpu.matmul %25, %26, %cst_22 {dimension_numbers = #tpu.dot_dimension_numbers<[1], [0], [0], [1], [0, 0, 1, 1], [], []>} : vector<4x4xf32>, vector<4x16xf32>, vector<4x16xf32> -> vector<4x16xf32>
      %28 = vector.extract_strided_slice %27 {offsets = [0, 0], sizes = [2, 16], strides = [1, 1]} : vector<4x16xf32> to vector<2x16xf32>
      %29 = vector.extract_strided_slice %27 {offsets = [2, 0], sizes = [2, 16], strides = [1, 1]} : vector<4x16xf32> to vector<2x16xf32>
      %30 = arith.addf %28, %29 : vector<2x16xf32>
      %31 = arith.negf %30 : vector<2x16xf32>
      %32 = math.exp %31 : vector<2x16xf32>
      %cst_23 = arith.constant 1.000000e+00 : f32
      %33 = vector.broadcast %cst_23 : f32 to vector<2x16xf32>
      %34 = arith.addf %33, %32 : vector<2x16xf32>
      %35 = arith.divf %33, %34 : vector<2x16xf32>
      %c0_24 = arith.constant 0 : index
      %c0_25 = arith.constant 0 : index
      %c0_26 = arith.constant 0 : index
      %36 = vector.load %arg5[%c0_24, %c0_25, %c0_26] : memref<2x1x16xf32, #tpu.memory_space<vmem>>, vector<2x1x16xf32>
      %37 = vector.shape_cast %36 : vector<2x1x16xf32> to vector<2x16xf32>
      %38 = vector.shape_cast %35 : vector<2x16xf32> to vector<2x1x16xf32>
      tpu.vector_store %arg5[%c0_24, %c0_25, %c0_26], %38 {strides = array<i32>} : memref<2x1x16xf32, #tpu.memory_space<vmem>>, vector<2x1x16xf32>,
    } else {
    }
    return
  }
  func.func @transform_0(%arg0: i32, %arg1: i32) -> (i32, i32, i32) {
    %c0_i32 = arith.constant 0 : i32
    %c0_i32_0 = arith.constant 0 : i32
    return %arg0, %c0_i32, %arg1 : i32, i32, i32
  }
  func.func @transform_1(%arg0: i32, %arg1: i32) -> (i32, i32) {
    %c0_i32 = arith.constant 0 : i32
    %c0_i32_0 = arith.constant 0 : i32
    %c0_i32_1 = arith.constant 0 : i32
    return %c0_i32, %c0_i32_0 : i32, i32
  }
  func.func @transform_2(%arg0: i32, %arg1: i32) -> (i32, i32) {
    %c0_i32 = arith.constant 0 : i32
    %c0_i32_0 = arith.constant 0 : i32
    %c0_i32_1 = arith.constant 0 : i32
    return %c0_i32, %c0_i32_0 : i32, i32
  }
  func.func @transform_3(%arg0: i32, %arg1: i32) -> (i32, i32, i32) {
    %c0_i32 = arith.constant 0 : i32
    %c0_i32_0 = arith.constant 0 : i32
    %c0_i32_1 = arith.constant 0 : i32
    return %arg0, %c0_i32, %c0_i32_0 : i32, i32, i32
  }
}

</mosaic_0001>

<bundles_post_ra>
// kernel: tpu_custom_call.1
= control target key start
LH: loop header
LB: loop body
LE: loop exit
PB: predicated region body
PF: predicated region fallthrough
CT: control target
= control target key end

     0   :  { %8 = vsyncpa [#allocation4], 0  ;;  %s340_s0 = inlined_call_operand.hbm [shape: f32[2,16,256], index: 0, kind: input, shape index: {}]   ;;  %s341_s1 = inlined_call_operand.vmem [shape: f32[16,4], index: 1, kind: input, shape index: {}]   ;;  %s342_s2 = inlined_call_operand.vmem [shape: f32[4,16], index: 2, kind: input, shape index: {}]   ;;  %s343_s3 = inlined_call_operand.hbm [shape: f32[2,1,16], index: 3, kind: output, shape index: {}]  }
   0x1   :  { %9 = vsyncpa [#allocation5], 0  ;;  %s14_s14 = sshll.u32 %s340_s0, 4  ;;  %s288_s15 = smov [#allocation3]   ;;  %s15_s14 = int_to_ptr.hbm [resolvable:$true] %s14_s14 }
   0x2   :  { %s16_s16 = sshll.u32 %s288_s15, 4  ;;  %s289_s17 = smov 256   ;;  %s17_s16 = int_to_ptr.vmem [resolvable:$true] %s16_s16 }
   0x3   :  { %s290_s18 = smov 16  }
   0x4   :  { %22 = dma.hbm_to_vmem [thread:$0]  %s15_s14, 1024, %s17_s16, [#allocation4], %s289_s17, %s289_s17, %s290_s18  }
   0x5   :  { %284 = dma.done.wait [#allocation4], 1024  }
   0x6   :  { %285 = vsyncadd [#allocation4], 4294966272  ;;  %v45_v0 = vld [vmem:[#allocation3 + $0x20] sm:$0xff]  ;;  %v46_v1 = vld [vmem:[#allocation3 + $0x28] sm:$0xff]  ;;  %v35_v16 = vlaneseq  ;;  %v291_v18 = vmov 0.0   ;;  %vm39_vm1 = vcmask 125952  }
   0x7   :  { %v41_v2 = vld [vmem:[#allocation3] sm:$0xff]  ;;  %v56_v3 = vmax.f32 %v45_v0, %v46_v1  ;;  %v42_v4 = vld [vmem:[#allocation3 + $0x8] sm:$0xff]  ;;  %v47_v7 = vld [vmem:[#allocation3 + $0x30] sm:$0xff]  ;;  %v89_v15 = vadd.f32 %v46_v1, %v45_v0  ;;  %vm71_vm2 = vcmask 130112   ;;  %vm76_vm3 = vcmask 1041409   ;;  %s209_s26 = sshll.u32 %s343_s3, 4  ;;  %s210_s26 = int_to_ptr.hbm [resolvable:$true] %s209_s26 }
   0x8   :  { %v83_v5 = vadd.f32 %v42_v4, %v41_v2  ;;  %v50_v6 = vmax.f32 %v41_v2, %v42_v4  ;;  %v48_v8 = vld [vmem:[#allocation3 + $0x38] sm:$0xff]  ;;  %v43_v9 = vld [vmem:[#allocation3 + $0x10] sm:$0xff]  ;;  %v36_v17 = vshrl.u32 %v35_v16, 7  ;;  %v119_v20 = vld [vmem:[%s341_s1 + $0x8] sm:$0xff]  ;;  %v67_v24 = vand.u32 127, %v35_v16  ;;  %s293_s27 = smov 1  }
   0x9   :  { %57 = vmax.xlane.f32.xlu1 %v56_v3  ;;  %v44_v10 = vld [vmem:[#allocation3 + $0x18] sm:$0xff]  ;;  %v59_v11 = vmax.f32 %v47_v7, %v48_v8  ;;  %v92_v14 = vadd.f32 %v48_v8, %v47_v7  ;;  %138 = vmatpush.msra.mxu0 %v119_v20  ;;  %vm80_vm4 = vcmask 123904   ;;  %vm120_vm5 = vcmask 130048  }
   0xa   :  { %84 = vadd.xlane.f32.xlu2 %v83_v5  ;;  %51 = vmax.xlane.f32.xlu0 %v50_v6  ;;  %v86_v12 = vadd.f32 %v44_v10, %v43_v9  ;;  %v53_v13 = vmax.f32 %v43_v9, %v44_v10  ;;  %vm37_vm0 = vcmp.lt.s32.totalorder %v36_v17, 2  ;;  %v118_v21 = vld [vmem:[%s341_s1] sm:$0xff]  ;;  %v69_v26 = vadd.s32 4294967288, %v67_v24 }
   0xb   :  { %v38_v19 = vsel %vm37_vm0, -inf, %v291_v18  ;;  %139 = vmatpush.msra.mxu0 %v118_v21  ;;  %v145_v53 = vld [vmem:[%s342_s2] sm:$0xf]  ;;  %vm150_vm6 = vcmask 1043456   ;;  %vm146_vm7 = vcmask 31744   ;;  %s292_s2 = smov [#allocation6]  }
   0xc   :  { %40 = vst.msk [vmem:[#allocation2] sm:$0xf] %vm39_vm1, %v38_v19  ;;  %223 = vmatpush.msk.msra.mxu1 %vm150_vm6, %v145_v53  ;;  %s207_s23 = sshll.u32 %s292_s2, 4  ;;  %vm200_vm11 = vcmask 122880   ;;  %s208_s23 = int_to_ptr.vmem [resolvable:$true] %s207_s23 }
  0x11   :  { %60 = vmax.xlane.f32.xlu1 %v59_v11 }
  0x12   :  { %87 = vadd.xlane.f32.xlu2 %v86_v12  ;;  %54 = vmax.xlane.f32.xlu0 %v53_v13 }
  0x13   :  { %v49_v34 = vld [vmem:[#allocation2] sm:$0x3]  ;;  %v82_v45 = vld [vmem:[#allocation2 + $0x2] sm:$0x3] }
  0x19   :  { %93 = vadd.xlane.f32.xlu1 %v92_v14 }
  0x1a   :  { %90 = vadd.xlane.f32.xlu0 %v89_v15 }
  0x7c   :  { %v58_v22 = vpop.xlane.xlu1 %57 }
  0x7d   :  { %v52_v23 = vpop.xlane.xlu0 %51  ;;  %v85_v25 = vpop.xlane.xlu2 %84  ;;  %v73_v28 = vperm.slane %v58_v22, %v67_v24 }
  0x7e   :  { %v68_v31 = vperm.slane %v52_v23, %v67_v24  ;;  %v99_v39 = vperm.slane %v85_v25, %v67_v24 }
  0x84   :  { %v61_v27 = vpop.xlane.xlu1 %60 }
  0x85   :  { %v74_v29 = vperm.slane %v61_v27, %v69_v26  ;;  %v55_v30 = vpop.xlane.xlu0 %54  ;;  %v88_v36 = vpop.xlane.xlu2 %87 }
  0x86   :  { %v70_v32 = vperm.slane %v55_v30, %v69_v26  ;;  %v100_v40 = vperm.slane %v88_v36, %v69_v26 }
  0x87   :  { %v75_v33 = vsel %vm71_vm2, %v74_v29, %v73_v28 }
  0x88   :  { %v72_v35 = vsel %vm71_vm2, %v70_v32, %v68_v31  ;;  %v101_v46 = vsel %vm71_vm2, %v100_v40, %v99_v39 }
  0x89   :  { %v77_v37 = vsel %vm76_vm3, %v75_v33, %v72_v35 }
  0x8a   :  { %v79_v38 = vmax.f32 %v49_v34, %v77_v37 }
  0x8c   :  { %v94_v41 = vpop.xlane.xlu1 %93  ;;  %81 = vst.msk [vmem:[#allocation2] sm:$0x3] %vm80_vm4, %v79_v38 }
  0x8d   :  { %v103_v42 = vperm.slane %v94_v41, %v69_v26  ;;  %v91_v43 = vpop.xlane.xlu0 %90 }
  0x8e   :  { %v102_v44 = vperm.slane %v91_v43, %v67_v24 }
  0x90   :  { %v104_v47 = vsel %vm71_vm2, %v103_v42, %v102_v44 }
  0x91   :  { %v105_v48 = vsel %vm76_vm3, %v104_v47, %v101_v46 }
  0x92   :  { %v107_v49 = vadd.f32 %v105_v48, %v82_v45 }
  0x94   :  { %108 = vst.msk [vmem:[#allocation2 + $0x2] sm:$0x3] %vm80_vm4, %v107_v49 }
  0x9b   :  { %v112_v50 = vld [vmem:[#allocation2] sm:$0xf] }
  0x9c   :  { %v116_v51 = vmul.f32 0.00390625, %v112_v50 }
  0x9e   :  { %v117_v52 = vsel %vm37_vm0, %v112_v50, %v116_v51 }
  0x9f   :  { %222 = vmatmul.msk.f32.vlgmr.msra.gmra.mxu0 %vm120_vm5, %v117_v52 }
 0x11c   :  { %v141_v54 = vpop.f32.mrf.mxu0 }
 0x11d   :  { %v144_v55 = vmax.f32 %v141_v54, 0.0 }
 0x11f   :  { %224 = vmatmul.msk.f32.vlgmr.msra.gmra.mxu1 %vm146_vm7, %v144_v55 }
 0x19c   :  { %v171_v56 = vpop.f32.mrf.mxu1 }
 0x19d   :  { %v175_v57 = vrot.slane %v171_v56, 2 }
 0x19f   :  { %v177_v58 = vadd.f32 %v175_v57, %v171_v56 }
 0x1a1   :  { %v225_v59 = vmul.f32 -1.442695, %v177_v58 }
 0x1a3   :  { %232 = vpow2.f32 %v225_v59 }
 0x1a9   :  { %v233_v60 = vpop.eup %232 }
 0x1aa   :  { %v181_v61 = vadd.f32 1.0, %v233_v60 }
 0x1ac   :  { %234 = vrcp.f32 %v181_v61  ;;  %v193_v1 = vand.u32 2147483648, %v181_v61  ;;  %v191_v3 = vand.u32 2147483647, %v181_v61  ;;  %vm187_vm9 = vweird.f32 %v181_v61 }
 0x1ae   :  { %v194_v5 = vor.u32 1.1754944e-38, %v193_v1  ;;  %vm192_vm12 = vcmp.eq.f32.partialorder %v191_v3, 8.507059e+37 }
 0x1b2   :  { %v235_v62 = vpop.eup %234 }
 0x1b3   :  { %v183_v63 = vmul.f32 %v235_v62, %v181_v61  ;;  %vm188_vm8 = vweird.f32 %v235_v62 }
 0x1b4   :  { %vm189_vm10 = vmor %vm187_vm9, %vm188_vm8 }
 0x1b5   :  { %v184_v0 = vsub.f32 1.0, %v183_v63 }
 0x1b7   :  { %v185_v2 = vmul.f32 %v235_v62, %v184_v0 }
 0x1b9   :  { %v186_v4 = vadd.f32 %v235_v62, %v185_v2 }
 0x1bb   :  { %v190_v6 = vsel %vm189_vm10, %v235_v62, %v186_v4 }
 0x1bc   :  { %v195_v7 = vsel %vm192_vm12, %v194_v5, %v190_v6 }
 0x1bd   :  { %v198_v8 = vrot.slane %v195_v7, 1  ;;  %201 = vst.msk [vmem:[#allocation6] sm:$0x1] %vm200_vm11, %v195_v7 }
 0x1bf   :  { %202 = vst.msk [vmem:[#allocation6 + $0x1] sm:$0x1] %vm200_vm11, %v198_v8 }
 0x1c0   :  { %215 = dma.vmem_to_hbm [thread:$0]  %s208_s23, 32, %s210_s26, [#allocation5], %s290_s18, %s290_s18, %s293_s27  }
 0x1c1   :  { %286 = dma.done.wait [#allocation5], 32  }
 0x1c2   :  { %287 = vsyncadd [#allocation5], 4294967264 }
 0x1c3   :  { %220 = vsyncpa [#allocation4], 1 }
 0x1c4   :  { %221 = vsyncpa [#allocation5], 1 }

</bundles_post_ra>
